<compile_context>
chip_gen: v7x
topology: tpu7x:2x2x1
jax: 0.10.0
libtpu: 0.0.40
codegen_flags: <defaults>
</compile_context>

<pallas_src>
import functools

import jax
import jax.numpy as jnp
from jax.experimental import pallas as pl
from jax.experimental.pallas import tpu as pltpu

INPUT_DIM = 8
FC1_DIM = 400
NMB_ACTIONS = 2
FC2_DIM = 200
OUT_DIM = 1

# Lane-aligned (padded) dims used inside the kernel.
FC1_PAD = 512
FC2_PAD = 256
OUT_PAD = 128

DEFAULT_TILE_B = 256  # multiple of 8; modest enough for v7x's smaller VMEM


def _round_up(x, m):
    return ((x + m - 1) // m) * m


def _critic_kernel(state_ref, action_ref,
                   w1_ref, b1_ref, a1_ref,
                   w2x_ref, w2a_ref, b2_ref, a2_ref,
                   w3_ref, b3_ref,
                   out_ref):
    # PReLU alphas: scalars from SMEM.
    a1 = a1_ref[0, 0]
    a2 = a2_ref[0, 0]

    # fc1: (TILE_B, 8) @ (8, 512) on the MXU, bf16 operands, f32 accumulate.
    h1 = jnp.dot(state_ref[...].astype(jnp.bfloat16), w1_ref[...],
                 preferred_element_type=jnp.float32) + b1_ref[...]
    h1 = jnp.where(h1 >= 0.0, h1, a1 * h1)

    # fc2 over concat([h1, action]) expressed as a split matmul:
    #   concat([h1, a]) @ W2 == h1 @ W2x + a @ W2a
    h2 = (jnp.dot(h1.astype(jnp.bfloat16), w2x_ref[...],
                  preferred_element_type=jnp.float32) + b2_ref[...])
    # K=2 action contribution on the VPU (broadcast FMAs, f32) instead of MXU.
    act = action_ref[...]
    h2 = h2 + act[:, 0:1] * w2a_ref[0:1, :] + act[:, 1:2] * w2a_ref[1:2, :]
    h2 = jnp.where(h2 >= 0.0, h2, a2 * h2)

    # fc3 (output padded to 128 lanes -> unmasked stores; column 0 is real).
    out_ref[...] = (jnp.dot(h2.astype(jnp.bfloat16), w3_ref[...],
                            preferred_element_type=jnp.float32) + b3_ref[...])


@functools.partial(jax.jit, static_argnames=("tile_b",))
def critic_forward(state, action, params, *, tile_b=DEFAULT_TILE_B):
    """state: (B, 8) f32, action: (B, 2) f32 -> (B, 1) f32."""
    B = state.shape[0]

    # Pick a batch tile: multiple of 8, no bigger than the (8-rounded) batch.
    tile_b = max(8, (int(tile_b) // 8) * 8)
    tile_b = min(tile_b, _round_up(B, 8))
    Bp = _round_up(B, tile_b)
    if Bp != B:
        state = jnp.pad(state, ((0, Bp - B), (0, 0)))
        action = jnp.pad(action, ((0, Bp - B), (0, 0)))

    grid = (Bp // tile_b,)

    def batch_spec(feat):
        return pl.BlockSpec((tile_b, feat), lambda i: (i, 0))

    def resident_spec(arr):   # weights/biases stay in VMEM across all tiles
        return pl.BlockSpec(arr.shape, lambda i: (0, 0))

    def smem_scalar_spec():
        return pl.BlockSpec((1, 1), lambda i: (0, 0),
                            memory_space=pltpu.MemorySpace.SMEM)

    inputs = (state, action,
              params["w1"], params["b1"], params["a1"],
              params["w2x"], params["w2a"], params["b2"], params["a2"],
              params["w3"], params["b3"])

    in_specs = [
        batch_spec(INPUT_DIM),            # state  (tile_b, 8)   f32
        batch_spec(NMB_ACTIONS),          # action (tile_b, 2)   f32
        resident_spec(params["w1"]),      # w1  (8, 512)   bf16
        resident_spec(params["b1"]),      # b1  (1, 512)   f32
        smem_scalar_spec(),               # a1  (1, 1)     f32 scalar
        resident_spec(params["w2x"]),     # w2x (512, 256) bf16
        resident_spec(params["w2a"]),     # w2a (2, 256)   f32 (VPU path)
        resident_spec(params["b2"]),      # b2  (1, 256)   f32
        smem_scalar_spec(),               # a2  (1, 1)     f32 scalar
        resident_spec(params["w3"]),      # w3  (256, 128) bf16
        resident_spec(params["b3"]),      # b3  (1, 128)   f32
    ]

    out_padded = pl.pallas_call(
        _critic_kernel,
        out_shape=jax.ShapeDtypeStruct((Bp, OUT_PAD), jnp.float32),
        grid=grid,
        in_specs=in_specs,
        out_specs=pl.BlockSpec((tile_b, OUT_PAD), lambda i: (i, 0)),
        compiler_params=pltpu.CompilerParams(
            dimension_semantics=("parallel",)),
    )(*inputs)

    return out_padded[:B, :OUT_DIM]


def init_params(key):
    """Deterministic init mirroring PyTorch nn.Linear default
    (U[-1/sqrt(fan_in), +1/sqrt(fan_in)]) and nn.PReLU default alpha = 0.25.
    Weights are stored (in, out), zero-padded to lane-aligned dims, matmul
    weights in bf16, biases / small vectors in f32."""
    ks = jax.random.split(key, 6)

    def lin(kw, kb, fan_in, fan_out):
        bound = 1.0 / jnp.sqrt(jnp.float32(fan_in))
        w = jax.random.uniform(kw, (fan_in, fan_out), jnp.float32, -bound, bound)
        b = jax.random.uniform(kb, (1, fan_out), jnp.float32, -bound, bound)
        return w, b

    w1, b1 = lin(ks[0], ks[1], INPUT_DIM, FC1_DIM)
    # fc2 has fan_in = 402 (h1 ++ action); split the weight into the two parts.
    w2_full, b2 = lin(ks[2], ks[3], FC1_DIM + NMB_ACTIONS, FC2_DIM)
    w2x = w2_full[:FC1_DIM]
    w2a = w2_full[FC1_DIM:]
    w3, b3 = lin(ks[4], ks[5], FC2_DIM, OUT_DIM)

    def pad2(x, rows, cols):
        return jnp.pad(x, ((0, rows - x.shape[0]), (0, cols - x.shape[1])))

    params = dict(
        # fc1: 8 -> 512 (400 real)
        w1=pad2(w1, INPUT_DIM, FC1_PAD).astype(jnp.bfloat16),
        b1=pad2(b1, 1, FC1_PAD),
        a1=jnp.full((1, 1), 0.25, jnp.float32),
        # fc2: 512 -> 256 (400->200 real) + action part (2 -> 256)
        w2x=pad2(w2x, FC1_PAD, FC2_PAD).astype(jnp.bfloat16),
        w2a=pad2(w2a, NMB_ACTIONS, FC2_PAD),            # f32, used on the VPU
        b2=pad2(b2, 1, FC2_PAD),
        a2=jnp.full((1, 1), 0.25, jnp.float32),
        # fc3: 256 -> 128 (200 -> 1 real)
        w3=pad2(w3, FC2_PAD, OUT_PAD).astype(jnp.bfloat16),
        b3=pad2(b3, 1, OUT_PAD),
    )
    return params


def _unpadded_f32(p):
    """Recover the exact (unpadded, f32) weights for the references."""
    return dict(
        w1=p["w1"].astype(jnp.float32)[:, :FC1_DIM],
        b1=p["b1"][:, :FC1_DIM],
        a1=p["a1"],
        w2x=p["w2x"].astype(jnp.float32)[:FC1_DIM, :FC2_DIM],
        w2a=p["w2a"][:, :FC2_DIM],
        b2=p["b2"][:, :FC2_DIM],
        a2=p["a2"],
        w3=p["w3"].astype(jnp.float32)[:FC2_DIM, :OUT_DIM],
        b3=p["b3"][:, :OUT_DIM],
    )


def critic_forward_ref(state, action, p):
    """Plain-JAX reference: exact f32, original concat-based formulation
    (PyTorch semantics)."""
    q = _unpadded_f32(p)
    h1 = jnp.dot(state, q["w1"], preferred_element_type=jnp.float32) + q["b1"]
    h1 = jnp.where(h1 >= 0, h1, q["a1"][0, 0] * h1)
    cat = jnp.concatenate([h1, action], axis=1)
    w2 = jnp.concatenate([q["w2x"], q["w2a"]], axis=0)
    h2 = jnp.dot(cat, w2, preferred_element_type=jnp.float32) + q["b2"]
    h2 = jnp.where(h2 >= 0, h2, q["a2"][0, 0] * h2)
    return jnp.dot(h2, q["w3"], preferred_element_type=jnp.float32) + q["b3"]


def critic_forward_mirror(state, action, p):
    """Plain-JAX reference that mirrors the kernel math exactly
    (bf16 MXU operands, f32 accumulation, split fc2, f32 action term)."""
    q = _unpadded_f32(p)
    h1 = jnp.dot(state.astype(jnp.bfloat16), q["w1"].astype(jnp.bfloat16),
                 preferred_element_type=jnp.float32) + q["b1"]
    h1 = jnp.where(h1 >= 0, h1, q["a1"][0, 0] * h1)
    h2 = jnp.dot(h1.astype(jnp.bfloat16), q["w2x"].astype(jnp.bfloat16),
                 preferred_element_type=jnp.float32) + q["b2"]
    h2 = h2 + action[:, 0:1] * q["w2a"][0:1, :] + action[:, 1:2] * q["w2a"][1:2, :]
    h2 = jnp.where(h2 >= 0, h2, q["a2"][0, 0] * h2)
    return jnp.dot(h2.astype(jnp.bfloat16), q["w3"].astype(jnp.bfloat16),
                   preferred_element_type=jnp.float32) + q["b3"]


if __name__ == "__main__":
    key = jax.random.PRNGKey(0)
    kp, ks, ka = jax.random.split(key, 3)

    B = 24
    params = init_params(kp)
    state = jax.random.normal(ks, (B, INPUT_DIM), jnp.float32)
    action = jax.random.normal(ka, (B, NMB_ACTIONS), jnp.float32)

    # Small tile so the batch grid (3 steps) is actually exercised.
    out = critic_forward(state, action, params, tile_b=8)
    out = jax.block_until_ready(out)
    assert out.shape == (B, OUT_DIM)

    # Tight check vs. a reference that mirrors the kernel math exactly.
    ref_mirror = critic_forward_mirror(state, action, params)
    assert jnp.allclose(out, ref_mirror, atol=2e-3, rtol=2e-3), (out, ref_mirror)

    # Loose check vs. the exact f32 PyTorch-semantics reference (bf16 quantization).
    ref_f32 = critic_forward_ref(state, action, params)
    assert jnp.allclose(out, ref_f32, atol=5e-2, rtol=5e-2), (out, ref_f32)

    # Also exercise the default (larger) tile path once.
    out2 = jax.block_until_ready(critic_forward(state, action, params))
    assert jnp.allclose(out, out2, atol=1e-5, rtol=1e-5)

    print("KERNEL_OK")
</pallas_src>

<mosaic_0001>
module attributes {stable_mosaic.version = 11 : i64} {
  func.func @_critic_kernel(%arg0: i32, %arg1: memref<8x8xf32, #tpu.memory_space<vmem>>, %arg2: memref<8x2xf32, #tpu.memory_space<vmem>>, %arg3: memref<8x512xbf16, #tpu.memory_space<vmem>>, %arg4: memref<1x512xf32, #tpu.memory_space<vmem>>, %arg5: memref<1x1xf32, #tpu.memory_space<smem>>, %arg6: memref<512x256xbf16, #tpu.memory_space<vmem>>, %arg7: memref<2x256xf32, #tpu.memory_space<vmem>>, %arg8: memref<1x256xf32, #tpu.memory_space<vmem>>, %arg9: memref<1x1xf32, #tpu.memory_space<smem>>, %arg10: memref<256x128xbf16, #tpu.memory_space<vmem>>, %arg11: memref<1x128xf32, #tpu.memory_space<vmem>>, %arg12: memref<8x128xf32, #tpu.memory_space<vmem>>) attributes {dimension_semantics = [#tpu.dimension_semantics<parallel>], iteration_bounds = array<i64: 3>, scalar_prefetch = 0 : i64, scratch_operands = 0 : i64, tpu.core_type = #tpu.core_type<tc>, window_params = [{transform_indices = @transform_0, window_bounds = array<i64: 8, 8>}, {transform_indices = @transform_1, window_bounds = array<i64: 8, 2>}, {pipeline_mode = #tpu.pipeline_mode<synchronous>, transform_indices = @transform_2, window_bounds = array<i64: 8, 512>}, {pipeline_mode = #tpu.pipeline_mode<synchronous>, transform_indices = @transform_3, window_bounds = array<i64: 1, 512>}, {transform_indices = @transform_4, window_bounds = array<i64: 1, 1>}, {pipeline_mode = #tpu.pipeline_mode<synchronous>, transform_indices = @transform_5, window_bounds = array<i64: 512, 256>}, {pipeline_mode = #tpu.pipeline_mode<synchronous>, transform_indices = @transform_6, window_bounds = array<i64: 2, 256>}, {pipeline_mode = #tpu.pipeline_mode<synchronous>, transform_indices = @transform_7, window_bounds = array<i64: 1, 256>}, {transform_indices = @transform_8, window_bounds = array<i64: 1, 1>}, {pipeline_mode = #tpu.pipeline_mode<synchronous>, transform_indices = @transform_9, window_bounds = array<i64: 256, 128>}, {pipeline_mode = #tpu.pipeline_mode<synchronous>, transform_indices = @transform_10, window_bounds = array<i64: 1, 128>}, {transform_indices = @transform_11, window_bounds = array<i64: 8, 128>}]} {
    %c0 = arith.constant 0 : index
    %c0_0 = arith.constant 0 : index
    %0 = memref.load %arg5[%c0, %c0_0] : memref<1x1xf32, #tpu.memory_space<smem>>
    %c0_1 = arith.constant 0 : index
    %c0_2 = arith.constant 0 : index
    %1 = memref.load %arg9[%c0_1, %c0_2] : memref<1x1xf32, #tpu.memory_space<smem>>
    %c0_3 = arith.constant 0 : index
    %c0_4 = arith.constant 0 : index
    %2 = vector.load %arg1[%c0_3, %c0_4] : memref<8x8xf32, #tpu.memory_space<vmem>>, vector<8x8xf32>
    %3 = arith.truncf %2 : vector<8x8xf32> to vector<8x8xbf16>
    %c0_5 = arith.constant 0 : index
    %c0_6 = arith.constant 0 : index
    %4 = vector.load %arg3[%c0_5, %c0_6] : memref<8x512xbf16, #tpu.memory_space<vmem>>, vector<8x512xbf16>
    %cst = arith.constant dense<0.000000e+00> : vector<8x512xf32>
    %5 = tpu.matmul %3, %4, %cst {dimension_numbers = #tpu.dot_dimension_numbers<[1], [0], [0], [1], [0, 0, 1, 1], [], []>} : vector<8x8xbf16>, vector<8x512xbf16>, vector<8x512xf32> -> vector<8x512xf32>
    %c0_7 = arith.constant 0 : index
    %c0_8 = arith.constant 0 : index
    %6 = vector.load %arg4[%c0_7, %c0_8] : memref<1x512xf32, #tpu.memory_space<vmem>>, vector<1x512xf32>
    %7 = vector.broadcast %6 : vector<1x512xf32> to vector<8x512xf32>
    %8 = arith.addf %5, %7 : vector<8x512xf32>
    %cst_9 = arith.constant 0.000000e+00 : f32
    %9 = vector.broadcast %cst_9 : f32 to vector<8x512xf32>
    %10 = arith.cmpf oge, %8, %9 : vector<8x512xf32>
    %11 = vector.broadcast %0 : f32 to vector<8x512xf32>
    %12 = arith.mulf %11, %8 : vector<8x512xf32>
    %13 = arith.select %10, %8, %12 : vector<8x512xi1>, vector<8x512xf32>
    %14 = arith.truncf %13 : vector<8x512xf32> to vector<8x512xbf16>
    %c0_10 = arith.constant 0 : index
    %c0_11 = arith.constant 0 : index
    %15 = vector.load %arg6[%c0_10, %c0_11] : memref<512x256xbf16, #tpu.memory_space<vmem>>, vector<512x256xbf16>
    %cst_12 = arith.constant dense<0.000000e+00> : vector<8x256xf32>
    %16 = tpu.matmul %14, %15, %cst_12 {dimension_numbers = #tpu.dot_dimension_numbers<[1], [0], [0], [1], [0, 0, 1, 1], [], []>} : vector<8x512xbf16>, vector<512x256xbf16>, vector<8x256xf32> -> vector<8x256xf32>
    %c0_13 = arith.constant 0 : index
    %c0_14 = arith.constant 0 : index
    %17 = vector.load %arg8[%c0_13, %c0_14] : memref<1x256xf32, #tpu.memory_space<vmem>>, vector<1x256xf32>
    %18 = vector.broadcast %17 : vector<1x256xf32> to vector<8x256xf32>
    %19 = arith.addf %16, %18 : vector<8x256xf32>
    %c0_15 = arith.constant 0 : index
    %c0_16 = arith.constant 0 : index
    %20 = vector.load %arg2[%c0_15, %c0_16] : memref<8x2xf32, #tpu.memory_space<vmem>>, vector<8x2xf32>
    %21 = vector.extract_strided_slice %20 {offsets = [0, 0], sizes = [8, 1], strides = [1, 1]} : vector<8x2xf32> to vector<8x1xf32>
    %c0_17 = arith.constant 0 : index
    %c0_18 = arith.constant 0 : index
    %22 = vector.load %arg7[%c0_17, %c0_18] : memref<2x256xf32, #tpu.memory_space<vmem>>, vector<1x256xf32>
    %23 = vector.broadcast %21 : vector<8x1xf32> to vector<8x256xf32>
    %24 = vector.broadcast %22 : vector<1x256xf32> to vector<8x256xf32>
    %25 = arith.mulf %23, %24 : vector<8x256xf32>
    %26 = arith.addf %19, %25 : vector<8x256xf32>
    %27 = vector.extract_strided_slice %20 {offsets = [0, 1], sizes = [8, 1], strides = [1, 1]} : vector<8x2xf32> to vector<8x1xf32>
    %c1 = arith.constant 1 : index
    %c0_19 = arith.constant 0 : index
    %28 = vector.load %arg7[%c1, %c0_19] : memref<2x256xf32, #tpu.memory_space<vmem>>, vector<1x256xf32>
    %29 = vector.broadcast %27 : vector<8x1xf32> to vector<8x256xf32>
    %30 = vector.broadcast %28 : vector<1x256xf32> to vector<8x256xf32>
    %31 = arith.mulf %29, %30 : vector<8x256xf32>
    %32 = arith.addf %26, %31 : vector<8x256xf32>
    %cst_20 = arith.constant 0.000000e+00 : f32
    %33 = vector.broadcast %cst_20 : f32 to vector<8x256xf32>
    %34 = arith.cmpf oge, %32, %33 : vector<8x256xf32>
    %35 = vector.broadcast %1 : f32 to vector<8x256xf32>
    %36 = arith.mulf %35, %32 : vector<8x256xf32>
    %37 = arith.select %34, %32, %36 : vector<8x256xi1>, vector<8x256xf32>
    %38 = arith.truncf %37 : vector<8x256xf32> to vector<8x256xbf16>
    %c0_21 = arith.constant 0 : index
    %c0_22 = arith.constant 0 : index
    %39 = vector.load %arg10[%c0_21, %c0_22] : memref<256x128xbf16, #tpu.memory_space<vmem>>, vector<256x128xbf16>
    %cst_23 = arith.constant dense<0.000000e+00> : vector<8x128xf32>
    %40 = tpu.matmul %38, %39, %cst_23 {dimension_numbers = #tpu.dot_dimension_numbers<[1], [0], [0], [1], [0, 0, 1, 1], [], []>} : vector<8x256xbf16>, vector<256x128xbf16>, vector<8x128xf32> -> vector<8x128xf32>
    %c0_24 = arith.constant 0 : index
    %c0_25 = arith.constant 0 : index
    %41 = vector.load %arg11[%c0_24, %c0_25] : memref<1x128xf32, #tpu.memory_space<vmem>>, vector<1x128xf32>
    %42 = vector.broadcast %41 : vector<1x128xf32> to vector<8x128xf32>
    %43 = arith.addf %40, %42 : vector<8x128xf32>
    %c0_26 = arith.constant 0 : index
    %c0_27 = arith.constant 0 : index
    %44 = vector.load %arg12[%c0_26, %c0_27] : memref<8x128xf32, #tpu.memory_space<vmem>>, vector<8x128xf32>
    tpu.vector_store %arg12[%c0_26, %c0_27], %43 {strides = array<i32>} : memref<8x128xf32, #tpu.memory_space<vmem>>, vector<8x128xf32>,
    return
  }
  func.func @transform_0(%arg0: i32) -> (i32, i32) {
    %c0_i32 = arith.constant 0 : i32
    %c0_i32_0 = arith.constant 0 : i32
    return %arg0, %c0_i32 : i32, i32
  }
  func.func @transform_1(%arg0: i32) -> (i32, i32) {
    %c0_i32 = arith.constant 0 : i32
    %c0_i32_0 = arith.constant 0 : i32
    return %arg0, %c0_i32 : i32, i32
  }
  func.func @transform_2(%arg0: i32) -> (i32, i32) {
    %c0_i32 = arith.constant 0 : i32
    %c0_i32_0 = arith.constant 0 : i32
    %c0_i32_1 = arith.constant 0 : i32
    return %c0_i32, %c0_i32_0 : i32, i32
  }
  func.func @transform_3(%arg0: i32) -> (i32, i32) {
    %c0_i32 = arith.constant 0 : i32
    %c0_i32_0 = arith.constant 0 : i32
    %c0_i32_1 = arith.constant 0 : i32
    return %c0_i32, %c0_i32_0 : i32, i32
  }
  func.func @transform_4(%arg0: i32) -> (i32, i32) {
    %c0_i32 = arith.constant 0 : i32
    %c0_i32_0 = arith.constant 0 : i32
    %c0_i32_1 = arith.constant 0 : i32
    return %c0_i32, %c0_i32_0 : i32, i32
  }
  func.func @transform_5(%arg0: i32) -> (i32, i32) {
    %c0_i32 = arith.constant 0 : i32
    %c0_i32_0 = arith.constant 0 : i32
    %c0_i32_1 = arith.constant 0 : i32
    return %c0_i32, %c0_i32_0 : i32, i32
  }
  func.func @transform_6(%arg0: i32) -> (i32, i32) {
    %c0_i32 = arith.constant 0 : i32
    %c0_i32_0 = arith.constant 0 : i32
    %c0_i32_1 = arith.constant 0 : i32
    return %c0_i32, %c0_i32_0 : i32, i32
  }
  func.func @transform_7(%arg0: i32) -> (i32, i32) {
    %c0_i32 = arith.constant 0 : i32
    %c0_i32_0 = arith.constant 0 : i32
    %c0_i32_1 = arith.constant 0 : i32
    return %c0_i32, %c0_i32_0 : i32, i32
  }
  func.func @transform_8(%arg0: i32) -> (i32, i32) {
    %c0_i32 = arith.constant 0 : i32
    %c0_i32_0 = arith.constant 0 : i32
    %c0_i32_1 = arith.constant 0 : i32
    return %c0_i32, %c0_i32_0 : i32, i32
  }
  func.func @transform_9(%arg0: i32) -> (i32, i32) {
    %c0_i32 = arith.constant 0 : i32
    %c0_i32_0 = arith.constant 0 : i32
    %c0_i32_1 = arith.constant 0 : i32
    return %c0_i32, %c0_i32_0 : i32, i32
  }
  func.func @transform_10(%arg0: i32) -> (i32, i32) {
    %c0_i32 = arith.constant 0 : i32
    %c0_i32_0 = arith.constant 0 : i32
    %c0_i32_1 = arith.constant 0 : i32
    return %c0_i32, %c0_i32_0 : i32, i32
  }
  func.func @transform_11(%arg0: i32) -> (i32, i32) {
    %c0_i32 = arith.constant 0 : i32
    %c0_i32_0 = arith.constant 0 : i32
    return %arg0, %c0_i32 : i32, i32
  }
}

</mosaic_0001>

<bundles_post_ra>
// kernel: critic_forward.1
= control target key start
LH: loop header
LB: loop body
LE: loop exit
PB: predicated region body
PF: predicated region fallthrough
CT: control target
= control target key end

     0   :  { %s1944_s0 = inlined_call_operand.vmem [shape: f32[24,8], index: 0, kind: input, shape index: {}]   ;;  %s1945_s1 = inlined_call_operand.vmem [shape: f32[24,2], index: 1, kind: input, shape index: {}]   ;;  %s1946_s2 = inlined_call_operand.vmem [shape: bf16[8,512], index: 2, kind: input, shape index: {}]   ;;  %s1947_s3 = inlined_call_operand.vmem [shape: f32[1,512], index: 3, kind: input, shape index: {}]   ;;  %s1948_s4 = inlined_call_operand.<no memory space> [shape: f32[1,1], index: 4, kind: input, shape index: {}]   ;;  %s1949_s5 = inlined_call_operand.hbm [shape: bf16[512,256], index: 5, kind: input, shape index: {}]   ;;  %s1950_s6 = inlined_call_operand.vmem [shape: f32[2,256], index: 6, kind: input, shape index: {}]   ;;  %s1951_s7 = inlined_call_operand.vmem [shape: f32[1,256], index: 7, kind: input, shape index: {}]   ;;  %s1952_s8 = inlined_call_operand.<no memory space> [shape: f32[1,1], index: 8, kind: input, shape index: {}]   ;;  %s1953_s9 = inlined_call_operand.hbm [shape: bf16[256,128], index: 9, kind: input, shape index: {}]   ;;  %s1954_s10 = inlined_call_operand.vmem [shape: f32[1,128], index: 10, kind: input, shape index: {}]   ;;  %s1955_s11 = inlined_call_operand.vmem [shape: f32[24,128], index: 11, kind: output, shape index: {}]  }
   0x1   :  { %16 = sst [smem:[#allocation2]] %s1948_s4 }
   0x2   :  { %17 = sst [smem:[#allocation3]] %s1952_s8 }
   0x3   :  { %18 = vsyncpa [#allocation5], 0 }
   0x4   :  { %19 = vsyncpa [#allocation7], 0  ;;  %s1804_s21 = smov 0  }
   0x5 LB: > { %s1730_s22 = smov [#allocation4]   ;;  %s1810_s24 = sadd.s32 4294967295, %s1728_s21   ;;  %s1728_s21 = sphi %s1804_s21, %s25_s21  }
   0x6   : > { %s318_s23 = sshll.u32 %s1730_s22, 4  ;;  %p1381_p0 = scmp.ge.s32.totalorder %s1728_s21, 1  ;;  %s319_s23 = int_to_ptr.vmem [resolvable:$true] %s318_s23 }
   0x7   : > { %p297_p1 = scmp.lt.s32.totalorder %s1728_s21, 4  ;;  %p1956_p3 = scmp.eq.s32.totalorder %s1810_s24, 0 }
   0x8   : > { %s1731_s8 = smov [#allocation6]   ;;  %s1658_s29 = scalar_lea.hbm %s1949_s5, 8192 }
   0x9   : > { %p1814_p2 = pnand %p1381_p0, %p297_p1  ;;  %s340_s25 = sshll.u32 %s1731_s8, 4  ;;  %s1827_s25 = int_to_ptr.vmem [resolvable:$true] %s340_s25 }
   0xa   : > { %p1659_p6 = scmp.ne.s32.totalorder %s1949_s5, %s1658_s29  ;;  %p1665_p10 = scmp.lt.u32.totalorder %s1658_s29, %s1949_s5 }
   0xb   : > { %s1958_s4 = scalar_select %p1814_p2, 1, 0 }
   0xc   : > { %p1513_p4 = pneg %p1814_p2 }
   0xe   : > { %p1823_p5 = pnand %p1956_p3, %p1513_p4 }
  0x10   : > { %p1660_p7 = pneg %p1823_p5 }
  0x12   : > { %p1661_p8 = pnand %p1660_p7, %p1659_p6 }
  0x14   : > { %p1662_p9 = pneg %p1661_p8 }
  0x16   : > { %p1667_p11 = pnand %p1665_p10, %p1662_p9 }
  0x18   : > { %1670 = shalt.err (!%p1667_p11)
}
  0x19   : > { %s1671_s15 = scalar_lea.vmem %s319_s23, 8192  ;;  %p1679_p1 = scmp.lt.s32.totalorder %s319_s23, %s319_s23 }
  0x1a   : > { %p1672_p12 = scmp.ne.s32.totalorder %s319_s23, %s1671_s15  ;;  %p1680_p4 = scmp.lt.s32.totalorder %s1671_s15, %s1671_s15 }
  0x1c   : > { %p1674_p13 = pnand %p1672_p12, %p1660_p7  ;;  %p1681_p3 = por %p1680_p4, %p1679_p1 }
  0x1e   : > { %p1675_p0 = pneg %p1674_p13 }
  0x20   : > { %p1682_p2 = pnand %p1681_p3, %p1675_p0 }
  0x22   : > { %1685 = shalt.err (!%p1682_p2)
}
  0x23   : > { %s1732_s16 = smov 128   ;;  %s1733_s17 = smov 8  }
  0x24   : > { %1516 = dma.hbm_to_vmem [thread:$0]  (!%p1823_p5), %s1949_s5, 8192, %s319_s23, [#allocation5], %s1732_s16, %s1732_s16, %s1733_s17  }
  0x25   : > { %s1686_s8 = scalar_lea.hbm %s1953_s9, 2048 }
  0x26   : > { %p1687_p6 = scmp.ne.s32.totalorder %s1953_s9, %s1686_s8  ;;  %p1693_p8 = scmp.lt.u32.totalorder %s1686_s8, %s1953_s9 }
  0x28   : > { %p1689_p2 = pnand %p1687_p6, %p1660_p7 }
  0x2a   : > { %p1690_p3 = pneg %p1689_p2 }
  0x2c   : > { %p1695_p9 = pnand %p1693_p8, %p1690_p3 }
  0x2e   : > { %1698 = shalt.err (!%p1695_p9)
}
  0x2f   : > { %s1699_s23 = scalar_lea.vmem %s1827_s25, 2048  ;;  %p1707_p13 = scmp.lt.s32.totalorder %s1827_s25, %s1827_s25 }
  0x30   : > { %p1700_p10 = scmp.ne.s32.totalorder %s1827_s25, %s1699_s23  ;;  %p1708_p0 = scmp.lt.s32.totalorder %s1699_s23, %s1699_s23 }
  0x32   : > { %p1702_p11 = pnand %p1700_p10, %p1660_p7  ;;  %p1709_p1 = por %p1708_p0, %p1707_p13 }
  0x34   : > { %p1703_p12 = pneg %p1702_p11 }
  0x36   : > { %p1710_p4 = pnand %p1709_p1, %p1703_p12 }
  0x38   : > { %1713 = shalt.err (!%p1710_p4)
}
  0x39   : > { %s1734_s12 = smov 64   ;;  %s1735_s13 = smov 4  }
  0x3a   : > { %1519 = dma.hbm_to_vmem [thread:$0]  (!%p1823_p5), %s1953_s9, 2048, %s1827_s25, [#allocation7], %s1734_s12, %s1734_s12, %s1735_s13  }
  0x3b   : > { %p1960_p6 = scmp.ne.s32.totalorder %s1958_s4, 0 }
  0x3c   : > { %p1961_p7 = scmp.eq.s32.totalorder (!%p1960_p6), %s1810_s24, 0 }
  0x3d   : > { %373 = sbr.rel (%p1960_p6) target bundleno = 753 (0x2f1), region = 64 }
  0x44   : > { %1719 = dma.done.wait (%p1961_p7), [#allocation5], 8192   ;;  %p1962_p2 = pmov %p1961_p7 }
  0x46   : > { %1721 = vsyncadd (%p1962_p2), [#allocation5], 4294959104  ;;  %p1963_p3 = pmov %p1962_p2 }
  0x47   : > { %p1964_p8 = pmov %p1962_p2 }
  0x48   : > { %1723 = dma.done.wait (%p1963_p3), [#allocation7], 2048  }
  0x49   : > { %1725 = vsyncadd (%p1964_p8), [#allocation7], 4294965248  ;;  %p419_p9 = scmp.lt.s32.totalorder %s1810_s24, 2  ;;  %v1736_v0 = vmov 0   ;;  %v436_v1 = vld [vmem:[%s1946_s2] sm:$0xff]  ;;  %vm474_vm0 = vcmask 1043456  }
  0x4a   : > { %519 = vmatprep.mubr.bf16.mxu1 %v1736_v0  ;;  %1540 = vset.pattern.permute.xlu0 %v1736_v0  ;;  %v437_v3 = vld [vmem:[%s1946_s2 + $0x8] sm:$0xff]  ;;  %v1392_v4 = vcombine.high %v436_v1, %v436_v1  ;;  %v1391_v5 = vcombine.low %v436_v1, %v436_v1  ;;  %v1549_v12 = vld [vmem:[#allocation4 + $0x14] ss:$8 sps:$4 sm:$0xff]   ;;  %vm470_vm1 = vcmask 64512   ;;  %v1551_v14 = vld [vmem:[#allocation4 + $0x10] ss:$8 sps:$4 sm:$0xff]  }
  0x4b   : > { %s1966_s24 = smov (!%p419_p9, %s1810_s24), 2  ;;  %v1394_v6 = vcombine.high %v437_v3, %v437_v3  ;;  %v1546_v7 = vld [vmem:[#allocation4 + $0x4] ss:$8 sps:$4 sm:$0xff]   ;;  %v1393_v8 = vcombine.low %v437_v3, %v437_v3  ;;  %v1548_v9 = vld [vmem:[#allocation4] ss:$8 sps:$4 sm:$0xff]   ;;  %s432_s27 = sld [smem:[#allocation2]] }
  0x4c   : > { %s1888_s4 = sshll.u32 %s1966_s24, 3  ;;  %1395 = vmatprep.subr.msk.bf16.mxu1 %vm474_vm0, %v1392_v4  ;;  %v476_v10 = vsel %vm474_vm0, %v1391_v5, 0  ;;  %982 = vmatprep.subr.bf16.mxu0 %v1546_v7  ;;  %v1556_v15 = vld [vmem:[#allocation4 + $0x104] ss:$8 sps:$4 sm:$0xff]   ;;  %v1557_v17 = vld [vmem:[#allocation4 + $0x20] ss:$8 sps:$4 sm:$0xff]  }
  0x4d   : > { %s422_s16 = scalar_lea.vmem %s1944_s0, %s1888_s4  ;;  %488 = vmatpush1.bf16.msra.mxu1 %v476_v10  ;;  %983 = vmatpush1.bf16.msra.mxu0 %v1548_v9  ;;  %v482_v13 = vsel %vm474_vm0, %v1393_v8, 0  ;;  %v1552_v16 = vld [vmem:[#allocation4 + $0x24] ss:$8 sps:$4 sm:$0xff]   ;;  %v1558_v18 = vld [vmem:[#allocation4 + $0x34] ss:$8 sps:$4 sm:$0xff]   ;;  %s426_s8 = scalar_lea.vmem %s1945_s1, %s1888_s4 }
  0x4e   : > { %v434_v2 = vld [vmem:[%s422_s16] sm:$0xff]  ;;  %1397 = vmatprep.subr.msk.bf16.mxu1 %vm474_vm0, %v1394_v6  ;;  %984 = vmatprep.subr.bf16.mxu0 %v1549_v12  ;;  %v1562_v20 = vld [vmem:[#allocation4 + $0x114] ss:$8 sps:$4 sm:$0xff]   ;;  %v1563_v21 = vld [vmem:[#allocation4 + $0x30] ss:$8 sps:$4 sm:$0xff]   ;;  %s433_s25 = sld [smem:[#allocation3]]  ;;  %s430_s19 = scalar_lea.vmem %s1955_s11, %s1888_s4 }
  0x4f   : > { %v435_v11 = vpack.c.bf16 %v434_v2, %v434_v2  ;;  %v1554_v19 = vld [vmem:[#allocation4 + $0x100] ss:$8 sps:$4 sm:$0xff]   ;;  %v1564_v22 = vld [vmem:[#allocation4 + $0x44] ss:$8 sps:$4 sm:$0xff]   ;;  %v1560_v23 = vld [vmem:[#allocation4 + $0x110] ss:$8 sps:$4 sm:$0xff]  }
  0x50   : > { %v1568_v24 = vld [vmem:[#allocation4 + $0x124] ss:$8 sps:$4 sm:$0xff]   ;;  %v1569_v25 = vld [vmem:[#allocation4 + $0x40] ss:$8 sps:$4 sm:$0xff]   ;;  %v1570_v26 = vld [vmem:[#allocation4 + $0x54] ss:$8 sps:$4 sm:$0xff]  }
  0x51   : > { %1396 = vmatmul.mubr.msk.bf16.vlgmr.msra.gmra.mrb[0].mxu1 %vm470_vm1, %v435_v11  ;;  %985 = vmatpush1.bf16.msra.mxu0 %v1551_v14  ;;  %v1566_v27 = vld [vmem:[#allocation4 + $0x120] ss:$8 sps:$4 sm:$0xff]   ;;  %v1574_v28 = vld [vmem:[#allocation4 + $0x134] ss:$8 sps:$4 sm:$0xff]   ;;  %v1575_v29 = vld [vmem:[#allocation4 + $0x50] ss:$8 sps:$4 sm:$0xff]   ;;  %v440_v14 = vlaneseq }
  0x52   : > { %529 = vmatpush1.bf16.msra.mxu1 %v482_v13  ;;  %560 = vmatprep.mubr.bf16.mxu1 %v1736_v0  ;;  %v1576_v30 = vld [vmem:[#allocation4 + $0x64] ss:$8 sps:$4 sm:$0xff]   ;;  %v1572_v31 = vld [vmem:[#allocation4 + $0x130] ss:$8 sps:$4 sm:$0xff]   ;;  %v1581_v33 = vld [vmem:[#allocation4 + $0x60] ss:$8 sps:$4 sm:$0xff]  }
  0x53   : > { %1023 = vmatprep.subr.bf16.mxu1 %v1556_v15  ;;  %986 = vmatprep.subr.bf16.mxu0 %v1552_v16  ;;  %v1580_v32 = vld [vmem:[#allocation4 + $0x144] ss:$8 sps:$4 sm:$0xff]   ;;  %v1582_v34 = vld [vmem:[#allocation4 + $0x74] ss:$8 sps:$4 sm:$0xff]   ;;  %v1578_v35 = vld [vmem:[#allocation4 + $0x140] ss:$8 sps:$4 sm:$0xff]  }
  0x54   : > { %v1586_v36 = vld [vmem:[#allocation4 + $0x154] ss:$8 sps:$4 sm:$0xff]   ;;  %v1587_v37 = vld [vmem:[#allocation4 + $0x70] ss:$8 sps:$4 sm:$0xff]   ;;  %v1588_v38 = vld [vmem:[#allocation4 + $0x84] ss:$8 sps:$4 sm:$0xff]  }
  0x55   : > { %987 = vmatpush1.bf16.msra.mxu0 %v1557_v17  ;;  %v1584_v39 = vld [vmem:[#allocation4 + $0x150] ss:$8 sps:$4 sm:$0xff]   ;;  %v1592_v40 = vld [vmem:[#allocation4 + $0x164] ss:$8 sps:$4 sm:$0xff]   ;;  %v1593_v41 = vld [vmem:[#allocation4 + $0x80] ss:$8 sps:$4 sm:$0xff]  }
  0x56   : > { %988 = vmatprep.subr.bf16.mxu0 %v1558_v18  ;;  %v1594_v42 = vld [vmem:[#allocation4 + $0x94] ss:$8 sps:$4 sm:$0xff]   ;;  %v1590_v43 = vld [vmem:[#allocation4 + $0x160] ss:$8 sps:$4 sm:$0xff]   ;;  %v1599_v45 = vld [vmem:[#allocation4 + $0x90] ss:$8 sps:$4 sm:$0xff]  }
  0x57   : > { %v1598_v44 = vld [vmem:[#allocation4 + $0x174] ss:$8 sps:$4 sm:$0xff]   ;;  %v1600_v46 = vld [vmem:[#allocation4 + $0xa4] ss:$8 sps:$4 sm:$0xff]   ;;  %v1596_v47 = vld [vmem:[#allocation4 + $0x170] ss:$8 sps:$4 sm:$0xff]  }
  0x58   : > { %v1604_v48 = vld [vmem:[#allocation4 + $0x184] ss:$8 sps:$4 sm:$0xff]   ;;  %v1605_v49 = vld [vmem:[#allocation4 + $0xa0] ss:$8 sps:$4 sm:$0xff]   ;;  %v1606_v50 = vld [vmem:[#allocation4 + $0xb4] ss:$8 sps:$4 sm:$0xff]  }
  0x59   : > { %1398 = vmatmul.mubr.msk.bf16.vlgmr.msra.gmra.mrb[4].mxu1 %vm470_vm1, %v435_v11  ;;  %989 = vmatpush1.bf16.msra.mxu0 %v1563_v21  ;;  %v1602_v51 = vld [vmem:[#allocation4 + $0x180] ss:$8 sps:$4 sm:$0xff]   ;;  %v1610_v52 = vld [vmem:[#allocation4 + $0x194] ss:$8 sps:$4 sm:$0xff]   ;;  %v1611_v53 = vld [vmem:[#allocation4 + $0xb0] ss:$8 sps:$4 sm:$0xff]  }
  0x5a   : > { %1024 = vmatpush1.bf16.msra.mxu1 %v1554_v19  ;;  %990 = vmatprep.subr.bf16.mxu0 %v1564_v22  ;;  %v1612_v54 = vld [vmem:[#allocation4 + $0xc4] ss:$8 sps:$4 sm:$0xff]   ;;  %v1608_v55 = vld [vmem:[#allocation4 + $0x190] ss:$8 sps:$4 sm:$0xff]   ;;  %v1617_v57 = vld [vmem:[#allocation4 + $0xc0] ss:$8 sps:$4 sm:$0xff]   ;;  %v573_v22 = vstv %s432_s27 }
  0x5b   : > { %1025 = vmatprep.subr.bf16.mxu1 %v1562_v20  ;;  %v1616_v56 = vld [vmem:[#allocation4 + $0x1a4] ss:$8 sps:$4 sm:$0xff]   ;;  %v1618_v58 = vld [vmem:[#allocation4 + $0xd4] ss:$8 sps:$4 sm:$0xff]   ;;  %v1614_v59 = vld [vmem:[#allocation4 + $0x1a0] ss:$8 sps:$4 sm:$0xff]  }
  0x5c   : > { %v1622_v60 = vld [vmem:[#allocation4 + $0x1b4] ss:$8 sps:$4 sm:$0xff]   ;;  %v1623_v61 = vld [vmem:[#allocation4 + $0xd0] ss:$8 sps:$4 sm:$0xff]   ;;  %v1624_v63 = vld [vmem:[#allocation4 + $0xe4] ss:$8 sps:$4 sm:$0xff]  }
  0x5d   : > { %991 = vmatpush1.bf16.msra.mxu0 %v1569_v25  ;;  %v1620_v62 = vld [vmem:[#allocation4 + $0x1b0] ss:$8 sps:$4 sm:$0xff]   ;;  %v1628_v0 = vld [vmem:[#allocation4 + $0x1c4] ss:$8 sps:$4 sm:$0xff]   ;;  %v1626_v1 = vld [vmem:[#allocation4 + $0x1c0] ss:$8 sps:$4 sm:$0xff]  }
  0x5e   : > { %1026 = vmatpush1.bf16.msra.mxu1 %v1560_v23  ;;  %992 = vmatprep.subr.bf16.mxu0 %v1570_v26  ;;  %v1629_v2 = vld [vmem:[#allocation4 + $0xe0] ss:$8 sps:$4 sm:$0xff]   ;;  %v1630_v3 = vld [vmem:[#allocation4 + $0xf4] ss:$8 sps:$4 sm:$0xff]   ;;  %v1632_v4 = vld [vmem:[#allocation4 + $0x1d0] ss:$8 sps:$4 sm:$0xff]  }
  0x5f   : > { %1027 = vmatprep.subr.bf16.mxu1 %v1568_v24  ;;  %v1634_v5 = vld [vmem:[#allocation4 + $0x1d4] ss:$8 sps:$4 sm:$0xff]   ;;  %v1635_v6 = vld [vmem:[#allocation4 + $0xf0] ss:$8 sps:$4 sm:$0xff]   ;;  %v1638_v7 = vld [vmem:[#allocation4 + $0x1e4] ss:$8 sps:$4 sm:$0xff]  }
  0x60   : > { %v1636_v8 = vld [vmem:[#allocation4 + $0x1e0] ss:$8 sps:$4 sm:$0xff]   ;;  %v1641_v9 = vld [vmem:[#allocation4 + $0x1f4] ss:$8 sps:$4 sm:$0xff]   ;;  %v1639_v10 = vld [vmem:[#allocation4 + $0x1f0] ss:$8 sps:$4 sm:$0xff]  }
  0x61   : > { %993 = vmatpush1.bf16.msra.mxu0 %v1575_v29  ;;  %v1642_v11 = vld [vmem:[#allocation6 + $0x40] sm:$0xff]   ;;  %v1737_v13 = vmov 1   ;;  %v441_v15 = vshrl.u32 %v440_v14, 7 }
  0x62   : > { %1028 = vmatpush1.bf16.msra.mxu1 %v1566_v27  ;;  %994 = vmatprep.subr.bf16.mxu0 %v1576_v30  ;;  %v1064_v12 = vld [vmem:[%s426_s8] sm:$0xff] }
  0x63   : > { %1029 = vmatprep.subr.bf16.mxu1 %v1574_v28  ;;  %1068 = vperm.xlu0 %1540, %v1064_v12   ;;  %v1910_v16 = vsub.s32 0, %v441_v15  ;;  %v438_v17 = vld [vmem:[%s1947_s3] sm:$0xf]  ;;  %v1915_v18 = vsub.s32 1, %v441_v15  ;;  %v450_v25 = vsub.s32 2, %v441_v15  ;;  %v454_v28 = vsub.s32 3, %v441_v15 }
  0x65   : > { %995 = vmatpush1.bf16.msra.mxu0 %v1581_v33  ;;  %v443_v19 = vrot.slane %v438_v17, %v1910_v16  ;;  %v447_v20 = vrot.slane %v438_v17, %v1915_v18 }
  0x66   : > { %1030 = vmatpush1.bf16.msra.mxu1 %v1572_v31  ;;  %996 = vmatprep.subr.bf16.mxu0 %v1582_v34  ;;  %v455_v34 = vrot.slane %v438_v17, %v454_v28 }
  0x67   : > { %1031 = vmatprep.subr.bf16.mxu1 %v1580_v32  ;;  %1541 = vset.pattern.permute.xlu0 %v1737_v13  ;;  %v451_v32 = vrot.slane %v438_v17, %v450_v25 }
  0x68   : > { %1089 = vperm.xlu0 %1541, %v1064_v12  }
  0x69   : > { %997 = vmatpush1.bf16.msra.mxu0 %v1587_v37  ;;  %v1643_v37 = vld [vmem:[#allocation6] sm:$0xff]  }
  0x6a   : > { %1032 = vmatpush1.bf16.msra.mxu1 %v1578_v35  ;;  %998 = vmatprep.subr.bf16.mxu0 %v1588_v38 }
  0x6b   : > { %1033 = vmatprep.subr.bf16.mxu1 %v1586_v36 }
  0x6d   : > { %999 = vmatpush1.bf16.msra.mxu0 %v1593_v41 }
  0x6e   : > { %1034 = vmatpush1.bf16.msra.mxu1 %v1584_v39  ;;  %1000 = vmatprep.subr.bf16.mxu0 %v1594_v42 }
  0x6f   : > { %1035 = vmatprep.subr.bf16.mxu1 %v1592_v40  ;;  %v1644_v40 = vld [vmem:[#allocation6 + $0x48] sm:$0xff]  }
  0x71   : > { %1001 = vmatpush1.bf16.msra.mxu0 %v1599_v45 }
  0x72   : > { %1036 = vmatpush1.bf16.msra.mxu1 %v1590_v43  ;;  %1002 = vmatprep.subr.bf16.mxu0 %v1600_v46 }
  0x73   : > { %1037 = vmatprep.subr.bf16.mxu1 %v1598_v44 }
  0x75   : > { %1003 = vmatpush1.bf16.msra.mxu0 %v1605_v49  ;;  %v1646_v49 = vld [vmem:[#allocation6 + $0x50] sm:$0xff]  }
  0x76   : > { %1038 = vmatpush1.bf16.msra.mxu1 %v1596_v47  ;;  %1004 = vmatprep.subr.bf16.mxu0 %v1606_v50  ;;  %v1645_v47 = vld [vmem:[#allocation6 + $0x8] sm:$0xff]  }
  0x77   : > { %1039 = vmatprep.subr.bf16.mxu1 %v1604_v48 }
  0x79   : > { %1005 = vmatpush1.bf16.msra.mxu0 %v1611_v53  ;;  %v1647_v53 = vld [vmem:[#allocation6 + $0x10] sm:$0xff]  }
  0x7a   : > { %1040 = vmatpush1.bf16.msra.mxu1 %v1602_v51  ;;  %1006 = vmatprep.subr.bf16.mxu0 %v1612_v54 }
  0x7b   : > { %1041 = vmatprep.subr.bf16.mxu1 %v1610_v52 }
  0x7d   : > { %1007 = vmatpush1.bf16.msra.mxu0 %v1617_v57  ;;  %v1650_v57 = vld [vmem:[#allocation6 + $0x60] sm:$0xff]  }
  0x7e   : > { %1042 = vmatpush1.bf16.msra.mxu1 %v1608_v55  ;;  %1008 = vmatprep.subr.bf16.mxu0 %v1618_v58  ;;  %v1648_v55 = vld [vmem:[#allocation6 + $0x58] sm:$0xff]   ;;  %v1651_v58 = vld [vmem:[#allocation6 + $0x20] sm:$0xff]  }
  0x7f   : > { %1043 = vmatprep.subr.bf16.mxu1 %v1616_v56  ;;  %v1649_v56 = vld [vmem:[#allocation6 + $0x18] sm:$0xff]  }
  0x81   : > { %1009 = vmatpush1.bf16.msra.mxu0 %v1623_v61  ;;  %v1654_v61 = vld [vmem:[#allocation6 + $0x70] sm:$0xff]  }
  0x82   : > { %1044 = vmatpush1.bf16.msra.mxu1 %v1614_v59  ;;  %1010 = vmatprep.subr.bf16.mxu0 %v1624_v63  ;;  %v1652_v59 = vld [vmem:[#allocation6 + $0x68] sm:$0xff]   ;;  %v1656_v63 = vld [vmem:[#allocation6 + $0x78] sm:$0xff]  }
  0x83   : > { %1045 = vmatprep.subr.bf16.mxu1 %v1622_v60  ;;  %v1653_v60 = vld [vmem:[#allocation6 + $0x28] sm:$0xff]  }
  0x85   : > { %1011 = vmatpush1.bf16.msra.mxu0 %v1629_v2 }
  0x86   : > { %1046 = vmatpush1.bf16.msra.mxu1 %v1620_v62  ;;  %1012 = vmatprep.subr.bf16.mxu0 %v1630_v3  ;;  %v1655_v62 = vld [vmem:[#allocation6 + $0x30] sm:$0xff]  }
  0x87   : > { %1047 = vmatprep.subr.bf16.mxu1 %v1628_v0  ;;  %v1657_v0 = vld [vmem:[#allocation6 + $0x38] sm:$0xff]  }
  0x89   : > { %1013 = vmatpush1.bf16.msra.mxu0 %v1635_v6 }
  0x8a   : > { %1048 = vmatpush1.bf16.msra.mxu1 %v1626_v1  ;;  %1483 = vmatprep.subr.bf16.mxu0 %v1642_v11  ;;  %v650_v1 = vld [vmem:[%s1951_s7] sm:$0x3] }
  0x8b   : > { %1049 = vmatprep.subr.bf16.mxu1 %v1634_v5  ;;  %v1065_v5 = vld [vmem:[%s1950_s6] ss:$2 sm:$0x3] }
  0x8c   : > { %v1075_v11 = vrot.slane %v1065_v5, %v1910_v16  ;;  %v1079_v13 = vrot.slane %v1065_v5, %v1915_v18 }
  0x8e   : > { %1050 = vmatpush1.bf16.msra.mxu1 %v1632_v4 }
  0x8f   : > { %1051 = vmatprep.subr.bf16.mxu1 %v1638_v7  ;;  %v1463_v7 = vld [vmem:[%s1950_s6 + $0x1] ss:$2 sm:$0x3] }
  0x90   : > { %v1096_v12 = vrot.slane %v1463_v7, %v1910_v16  ;;  %v1100_v14 = vrot.slane %v1463_v7, %v1915_v18 }
  0x92   : > { %1052 = vmatpush1.bf16.msra.mxu1 %v1636_v8  ;;  %v655_v8 = vrot.slane %v650_v1, %v1910_v16  ;;  %v1109_v16 = vstv %s433_s25 }
  0x93   : > { %1053 = vmatprep.subr.bf16.mxu1 %v1641_v9 }
  0x96   : > { %1054 = vmatpush1.bf16.msra.mxu1 %v1639_v10  ;;  %v659_v10 = vrot.slane %v650_v1, %v1915_v18 }
  0xe2   : > { %v1069_v3 = vpop.permute.xlu0 %1068 }
  0xe3   : > { %v1083_v25 = vmul.f32 %v1079_v13, %v1069_v3 }
  0xe7   : > { %v1090_v15 = vpop.permute.xlu0 %1089 }
 0x124   : > { %v521_v21 = vpop.f32.mrb[0].mxu1 }
 0x125   : > { %v522_v23 = vadd.f32 %v521_v21, %v443_v19  ;;  %v523_v24 = vpop.f32.mrb[1].mxu1  ;;  %v1082_v21 = vmul.f32 %v1075_v11, %v1069_v3 }
 0x126   : > { %v524_v26 = vadd.f32 %v523_v24, %v447_v20  ;;  %v525_v27 = vpop.f32.mrb[2].mxu1  ;;  %v1103_v24 = vmul.f32 %v1096_v12, %v1090_v15 }
 0x127   : > { %vm569_vm2 = vcmp.ge.f32.partialorder %v522_v23, 0.0  ;;  %v574_v29 = vmul.f32 %v573_v22, %v522_v23  ;;  %v526_v30 = vpop.f32.mrb[3].mxu1  ;;  %v1104_v27 = vmul.f32 %v1100_v14, %v1090_v15 }
 0x128   : > { %vm570_vm3 = vcmp.ge.f32.partialorder %v524_v26, 0.0  ;;  %v575_v31 = vmul.f32 %v573_v22, %v524_v26 }
 0x129   : > { %v578_v33 = vsel %vm569_vm2, %v522_v23, %v574_v29 }
 0x12a   : > { %v579_v35 = vsel %vm570_vm3, %v524_v26, %v575_v31  ;;  %v582_v39 = vpack.c.bf16 %v578_v33, %v578_v33 }
 0x12b   : > { %v583_v36 = vpack.c.bf16 %v579_v35, %v579_v35 }
 0x12c   : > { %v562_v38 = vpop.f32.mrb[4].mxu1 }
 0x12d   : > { %v563_v41 = vadd.f32 %v562_v38, %v451_v32  ;;  %v564_v42 = vpop.f32.mrb[5].mxu1  ;;  %1014 = vmatprep.mubr.bf16.mxu0 %v583_v36 }
 0x12e   : > { %v565_v43 = vadd.f32 %v564_v42, %v455_v34  ;;  %v566_v44 = vpop.f32.mrb[6].mxu1  ;;  %1015 = vmatmul.mubr.bf16.vlgmr.msra.gmra.mrb[0].mxu0 %v582_v39 }
 0x12f   : > { %vm571_vm4 = vcmp.ge.f32.partialorder %v563_v41, 0.0  ;;  %v576_v45 = vmul.f32 %v573_v22, %v563_v41  ;;  %v567_v46 = vpop.f32.mrb[7].mxu1  ;;  %1484 = vmatpush3.bf16.msra.mxu0 %v1643_v37 }
 0x130   : > { %vm572_vm5 = vcmp.ge.f32.partialorder %v565_v43, 0.0  ;;  %v577_v48 = vmul.f32 %v573_v22, %v565_v43  ;;  %1485 = vmatprep.subr.bf16.mxu0 %v1644_v40  ;;  %v1464_v40 = vld [vmem:[%s1954_s10] ss:$0 sm:$0xff] }
 0x131   : > { %v580_v50 = vsel %vm571_vm4, %v563_v41, %v576_v45 }
 0x132   : > { %v581_v51 = vsel %vm572_vm5, %v565_v43, %v577_v48  ;;  %v584_v54 = vpack.c.bf16 %v580_v50, %v580_v50 }
 0x133   : > { %v585_v52 = vpack.c.bf16 %v581_v51, %v581_v51  ;;  %1486 = vmatpush3.bf16.msra.mxu0 %v1645_v47 }
 0x134   : > { %1487 = vmatprep.subr.bf16.mxu0 %v1646_v49 }
 0x135   : > { %1055 = vmatprep.mubr.bf16.mxu1 %v585_v52 }
 0x136   : > { %1056 = vmatmul.mubr.bf16.vlgmr.msra.gmra.mrb[8].mxu1 %v584_v54 }
 0x137   : > { %1488 = vmatpush3.bf16.msra.mxu0 %v1647_v53 }
 0x138   : > { %1489 = vmatprep.subr.bf16.mxu0 %v1648_v55 }
 0x13b   : > { %1490 = vmatpush3.bf16.msra.mxu0 %v1649_v56 }
 0x13c   : > { %1491 = vmatprep.subr.bf16.mxu0 %v1650_v57 }
 0x13f   : > { %1492 = vmatpush3.bf16.msra.mxu0 %v1651_v58 }
 0x140   : > { %1493 = vmatprep.subr.bf16.mxu0 %v1652_v59 }
 0x143   : > { %1494 = vmatpush3.bf16.msra.mxu0 %v1653_v60 }
 0x144   : > { %1495 = vmatprep.subr.bf16.mxu0 %v1654_v61 }
 0x147   : > { %1496 = vmatpush3.bf16.msra.mxu0 %v1655_v62 }
 0x148   : > { %1497 = vmatprep.subr.bf16.mxu0 %v1656_v63 }
 0x14b   : > { %1498 = vmatpush3.bf16.msra.mxu0 %v1657_v0 }
 0x201   : > { %v1016_v2 = vpop.f32.mrb[0].mxu0 }
 0x202   : > { %v1018_v4 = vpop.f32.mrb[1].mxu0  ;;  %v1017_v17 = vadd.f32 %v1016_v2, %v655_v8 }
 0x203   : > { %v1020_v6 = vpop.f32.mrb[2].mxu0  ;;  %v1019_v19 = vadd.f32 %v1018_v4, %v659_v10 }
 0x204   : > { %v1021_v9 = vpop.f32.mrb[3].mxu0 }
 0x209   : > { %v1057_v20 = vpop.f32.mrb[8].mxu1 }
 0x20a   : > { %v1058_v22 = vadd.f32 %v1057_v20, %v1017_v17  ;;  %v1059_v23 = vpop.f32.mrb[9].mxu1 }
 0x20b   : > { %v1060_v26 = vadd.f32 %v1059_v23, %v1019_v19  ;;  %v1061_v28 = vpop.f32.mrb[10].mxu1 }
 0x20c   : > { %v1084_v29 = vadd.f32 %v1082_v21, %v1058_v22  ;;  %v1062_v30 = vpop.f32.mrb[11].mxu1 }
 0x20d   : > { %v1085_v31 = vadd.f32 %v1083_v25, %v1060_v26 }
 0x20e   : > { %v1105_v32 = vadd.f32 %v1103_v24, %v1084_v29 }
 0x20f   : > { %v1106_v33 = vadd.f32 %v1104_v27, %v1085_v31 }
 0x210   : > { %vm1107_vm6 = vcmp.ge.f32.partialorder %v1105_v32, 0.0  ;;  %v1110_v18 = vmul.f32 %v1109_v16, %v1105_v32 }
 0x211   : > { %v1111_v34 = vmul.f32 %v1109_v16, %v1106_v33  ;;  %vm1108_vm7 = vcmp.ge.f32.partialorder %v1106_v33, 0.0 }
 0x212   : > { %v1112_v35 = vsel %vm1107_vm6, %v1105_v32, %v1110_v18 }
 0x213   : > { %v1113_v36 = vsel %vm1108_vm7, %v1106_v33, %v1111_v34  ;;  %v1114_v38 = vpack.c.bf16 %v1112_v35, %v1112_v35 }
 0x214   : > { %v1115_v37 = vpack.c.bf16 %v1113_v36, %v1113_v36 }
 0x216   : > { %1283 = vmatprep.mubr.bf16.mxu0 %v1115_v37 }
 0x217   : > { %1284 = vmatmul.mubr.bf16.vlgmr.msra.gmra.mrb[4].mxu0 %v1114_v38 }
 0x2ea   : > { %v1499_v39 = vpop.f32.mrb[4].mxu0 }
 0x2eb   : > { %v1500_v41 = vpop.f32.mrb[5].mxu0 }
 0x2ec   : > { %v1501_v42 = vadd.f32 %v1500_v41, %v1499_v39  ;;  %v1502_v43 = vpop.f32.mrb[6].mxu0 }
 0x2ed   : > { %v1503_v44 = vpop.f32.mrb[7].mxu0 }
 0x2ee   : > { %v1286_v45 = vadd.f32 %v1501_v42, %v1464_v40 }
 0x2f0   : > { %1291 = vst [vmem:[%s430_s19] sm:$0xff] %v1286_v45 }
 0x2f1 PF: > { %s25_s21 = sadd.s32 1, %s1728_s21  }
 0x2f2   : > { %p22_p5 = scmp.ge.s32.totalorder %s25_s21, 5  }
 0x2f4   :  { %24 = sbr.rel (!%p22_p5) target bundleno = 5 (0x5), region = 107 }
 0x2fb   :  { %1311 = vsyncpa [#allocation5], 1 }
 0x2fc   :  { %1313 = vsyncpa [#allocation5 + $0x1], 1 }
 0x2fd   :  { %1314 = vsyncpa [#allocation7], 1 }

</bundles_post_ra>
